<compile_context>
chip_gen: v6e
topology: v6e:2x2x1
jax: 0.10.0
libtpu: 0.0.40
codegen_flags: <defaults>
</compile_context>

<pallas_src>
import jax
import jax.numpy as jnp
from jax.experimental import pallas as pl
from jax.experimental.pallas import tpu as pltpu

BN_EPS = 1e-5


def _round_up(v, m):
    return ((v + m - 1) // m) * m


def _gin_fused_kernel(adj_ref, x_ref, w1_ref, b1_ref, w2_ref, b2_ref,
                      o_ref, h_ref):
    """Grid axis = GIN layer.  adj / x / out blocks are constant across the
    grid (stay resident in VMEM); per-layer folded weights stream in via the
    index_map.  The carried activation lives in a bf16 VMEM scratch."""
    l = pl.program_id(0)
    nl = pl.num_programs(0)

    # Initialize the carry with the (padded, bf16) node features.
    @pl.when(l == 0)
    def _():
        h_ref[...] = x_ref[...]

    # Neighbor aggregation on the MXU; (1 + eps) * I is already folded in.
    agg = jnp.dot(adj_ref[...], h_ref[...],
                  preferred_element_type=jnp.float32)

    # Inner Linear + BatchNorm1d(2E) (folded) + ReLU.
    z = jnp.dot(agg.astype(jnp.bfloat16), w1_ref[0],
                preferred_element_type=jnp.float32) + b1_ref[0]
    z = jnp.maximum(z, 0.0)

    # Outer Linear + encoder-level BatchNorm1d(E) (folded).
    z = jnp.dot(z.astype(jnp.bfloat16), w2_ref[0],
                preferred_element_type=jnp.float32) + b2_ref[0]

    # ReLU after every layer except the global last one; the conv1 path
    # (l == 0) always applies ReLU (this also covers num_layer == 1).
    apply_relu = jnp.logical_or(l == 0, l != nl - 1)
    z = jnp.where(apply_relu, jnp.maximum(z, 0.0), z)

    # Dropout(0.5) is identity in eval mode.

    # Carry to the next layer (bf16 == the precision the next matmul uses).
    @pl.when(l < nl - 1)
    def _():
        h_ref[...] = z.astype(jnp.bfloat16)

    # Final layer: emit the f32 result with a single lane-dense store.
    @pl.when(l == nl - 1)
    def _():
        o_ref[...] = z


def _fold_bn_into_linear(w, b, gamma, beta, mean, var):
    """Return (W', b') such that BN(x @ W + b) == x @ W' + b' (running stats)."""
    scale = gamma * jax.lax.rsqrt(var + BN_EPS)
    return w * scale[None, :], (b - mean) * scale + beta


def _pad_to(a, shape):
    return jnp.pad(a, [(0, s - d) for d, s in zip(a.shape, shape)])


def gin_encoder_forward(x, edge_index, layer_params):
    """Full GINEncoder forward (eval mode) in a single fused pallas_call."""
    n, in_dim = x.shape
    num_layer = len(layer_params)
    emb_dim = layer_params[0]["w2"].shape[1]
    hid = layer_params[0]["w1"].shape[1]

    n_pad = _round_up(n, 128)
    d_pad = _round_up(max(in_dim, emb_dim), 128)     # lane width of x / h / out
    h_pad = _round_up(hid, 128)                      # lane width of hidden

    # --- adjacency with the GIN self-term folded in: A' = A + (1+eps) * I ---
    src, dst = edge_index[0], edge_index[1]
    adj = jnp.zeros((n_pad, n_pad), jnp.float32).at[dst, src].add(1.0)
    diag = jnp.arange(n)
    adj = adj.at[diag, diag].add(1.0)                # eps = 0
    adj = adj.astype(jnp.bfloat16)                   # counts are exact in bf16

    # --- fold BatchNorms + biases into the linear weights, pad, stack -------
    w1s, b1s, w2s, b2s = [], [], [], []
    for p in layer_params:
        w1, b1 = _fold_bn_into_linear(p["w1"], p["b1"], p["bn_in_g"],
                                      p["bn_in_b"], p["bn_in_m"], p["bn_in_v"])
        w2, b2 = _fold_bn_into_linear(p["w2"], p["b2"], p["bn_out_g"],
                                      p["bn_out_b"], p["bn_out_m"], p["bn_out_v"])
        w1s.append(_pad_to(w1, (d_pad, h_pad)).astype(jnp.bfloat16))
        b1s.append(_pad_to(b1.reshape(1, -1), (1, h_pad)))
        w2s.append(_pad_to(w2, (h_pad, d_pad)).astype(jnp.bfloat16))
        b2s.append(_pad_to(b2.reshape(1, -1), (1, d_pad)))
    w1s = jnp.stack(w1s)                             # [L, d_pad, h_pad] bf16
    b1s = jnp.stack(b1s)                             # [L, 1, h_pad]     f32
    w2s = jnp.stack(w2s)                             # [L, h_pad, d_pad] bf16
    b2s = jnp.stack(b2s)                             # [L, 1, d_pad]     f32

    # Kernel consumes x only as a bf16 matmul operand -> cast once up front
    # (halves its DMA bytes, identical numerics to an in-kernel cast).
    x_pad = _pad_to(x, (n_pad, d_pad)).astype(jnp.bfloat16)

    # --- cost / VMEM hints --------------------------------------------------
    flops = 2 * num_layer * (n_pad * n_pad * d_pad
                             + n_pad * d_pad * h_pad
                             + n_pad * h_pad * d_pad)
    bytes_accessed = (adj.size * 2 + x_pad.size * 2 + w1s.size * 2
                      + b1s.size * 4 + w2s.size * 2 + b2s.size * 4
                      + n_pad * d_pad * 4)
    vmem_est = (2 * (adj.size * 2 + x_pad.size * 2
                     + d_pad * h_pad * 2 + h_pad * 4
                     + h_pad * d_pad * 2 + d_pad * 4
                     + n_pad * d_pad * 4)
                + n_pad * d_pad * 2          # bf16 carry scratch
                + (4 << 20))
    vmem_limit = int(min(max(vmem_est, 32 << 20), 60 << 20))   # v7x-safe

    out_pad = pl.pallas_call(
        _gin_fused_kernel,
        grid=(num_layer,),
        in_specs=[
            pl.BlockSpec((n_pad, n_pad), lambda l: (0, 0)),        # adj (resident)
            pl.BlockSpec((n_pad, d_pad), lambda l: (0, 0)),        # x   (resident)
            pl.BlockSpec((1, d_pad, h_pad), lambda l: (l, 0, 0)),  # W1'
            pl.BlockSpec((1, 1, h_pad), lambda l: (l, 0, 0)),      # b1'
            pl.BlockSpec((1, h_pad, d_pad), lambda l: (l, 0, 0)),  # W2'
            pl.BlockSpec((1, 1, d_pad), lambda l: (l, 0, 0)),      # b2'
        ],
        out_specs=pl.BlockSpec((n_pad, d_pad), lambda l: (0, 0)),  # resident out
        out_shape=jax.ShapeDtypeStruct((n_pad, d_pad), jnp.float32),
        scratch_shapes=[pltpu.VMEM((n_pad, d_pad), jnp.bfloat16)],  # carried h
        compiler_params=pltpu.CompilerParams(
            dimension_semantics=("arbitrary",),     # layer axis carries state
            vmem_limit_bytes=vmem_limit),
        cost_estimate=pl.CostEstimate(flops=flops, transcendentals=0,
                                      bytes_accessed=bytes_accessed),
    )(adj, x_pad, w1s, b1s, w2s, b2s)

    return out_pad[:n, :emb_dim]


def init_gin_layer_params(key, d_in, emb_dim):
    """Deterministic synthetic parameters for one GIN layer (module shapes)."""
    k1, k2, k3, k4 = jax.random.split(key, 4)
    hid = 2 * emb_dim
    return {
        # Linear weights stored as [in, out] so the kernel computes x @ W.
        "w1": jax.random.normal(k1, (d_in, hid), jnp.float32) * 0.1,
        "b1": jax.random.normal(k2, (hid,), jnp.float32) * 0.01,
        # inner BatchNorm1d(2E): PyTorch default init (gamma=1, beta=0, run 0/1)
        "bn_in_g": jnp.ones((hid,), jnp.float32),
        "bn_in_b": jnp.zeros((hid,), jnp.float32),
        "bn_in_m": jnp.zeros((hid,), jnp.float32),
        "bn_in_v": jnp.ones((hid,), jnp.float32),
        "w2": jax.random.normal(k3, (hid, emb_dim), jnp.float32) * 0.1,
        "b2": jax.random.normal(k4, (emb_dim,), jnp.float32) * 0.01,
        # encoder-level BatchNorm1d(E)
        "bn_out_g": jnp.ones((emb_dim,), jnp.float32),
        "bn_out_b": jnp.zeros((emb_dim,), jnp.float32),
        "bn_out_m": jnp.zeros((emb_dim,), jnp.float32),
        "bn_out_v": jnp.ones((emb_dim,), jnp.float32),
    }


if __name__ == "__main__":
    num_layer = 3
    in_dim = 16
    emb_dim = 32
    num_nodes = 64
    num_edges = 256

    key = jax.random.PRNGKey(0)
    kx, ke, kp = jax.random.split(key, 3)

    x = jax.random.normal(kx, (num_nodes, in_dim), jnp.float32)
    edge_index = jax.random.randint(ke, (2, num_edges), 0, num_nodes, jnp.int32)

    # Layer 0 maps in_dim -> emb_dim, subsequent layers emb_dim -> emb_dim.
    pkeys = jax.random.split(kp, num_layer)
    layer_params = [init_gin_layer_params(pkeys[0], in_dim, emb_dim)]
    layer_params += [init_gin_layer_params(pkeys[i], emb_dim, emb_dim)
                     for i in range(1, num_layer)]

    out = gin_encoder_forward(x, edge_index, layer_params)
    jax.block_until_ready(out)
    assert out.shape == (num_nodes, emb_dim), out.shape
    assert bool(jnp.all(jnp.isfinite(out)))
    print("KERNEL_OK")
</pallas_src>

<mosaic_0001>
module attributes {stable_mosaic.version = 11 : i64} {
  func.func @_gin_fused_kernel(%arg0: i32, %arg1: memref<128x128xbf16, #tpu.memory_space<vmem>>, %arg2: memref<128x128xbf16, #tpu.memory_space<vmem>>, %arg3: memref<1x128x128xbf16, #tpu.memory_space<vmem>>, %arg4: memref<1x1x128xf32, #tpu.memory_space<vmem>>, %arg5: memref<1x128x128xbf16, #tpu.memory_space<vmem>>, %arg6: memref<1x1x128xf32, #tpu.memory_space<vmem>>, %arg7: memref<128x128xf32, #tpu.memory_space<vmem>>, %arg8: memref<128x128xbf16, #tpu.memory_space<vmem>>) attributes {dimension_semantics = [#tpu.dimension_semantics<arbitrary>], iteration_bounds = array<i64: 3>, scalar_prefetch = 0 : i64, scratch_operands = 1 : i64, tpu.core_type = #tpu.core_type<tc>, window_params = [{pipeline_mode = #tpu.pipeline_mode<synchronous>, transform_indices = @transform_0, window_bounds = array<i64: 128, 128>}, {pipeline_mode = #tpu.pipeline_mode<synchronous>, transform_indices = @transform_1, window_bounds = array<i64: 128, 128>}, {transform_indices = @transform_2, window_bounds = array<i64: 1, 128, 128>}, {transform_indices = @transform_3, window_bounds = array<i64: 1, 1, 128>}, {transform_indices = @transform_4, window_bounds = array<i64: 1, 128, 128>}, {transform_indices = @transform_5, window_bounds = array<i64: 1, 1, 128>}, {pipeline_mode = #tpu.pipeline_mode<synchronous>, transform_indices = @transform_6, window_bounds = array<i64: 128, 128>}]} {
    %c0_i32 = arith.constant 0 : i32
    %0 = arith.cmpi eq, %arg0, %c0_i32 : i32
    %1 = arith.extui %0 : i1 to i32
    %c0_i32_0 = arith.constant 0 : i32
    %2 = arith.cmpi ne, %1, %c0_i32_0 : i32
    scf.if %2 {
      %c0_25 = arith.constant 0 : index
      %c0_26 = arith.constant 0 : index
      %36 = vector.load %arg2[%c0_25, %c0_26] : memref<128x128xbf16, #tpu.memory_space<vmem>>, vector<128x128xbf16>
      %c0_27 = arith.constant 0 : index
      %c0_28 = arith.constant 0 : index
      %37 = vector.load %arg8[%c0_27, %c0_28] : memref<128x128xbf16, #tpu.memory_space<vmem>>, vector<128x128xbf16>
      tpu.vector_store %arg8[%c0_27, %c0_28], %36 {strides = array<i32>} : memref<128x128xbf16, #tpu.memory_space<vmem>>, vector<128x128xbf16>,
    } else {
    }
    %c0 = arith.constant 0 : index
    %c0_1 = arith.constant 0 : index
    %3 = vector.load %arg1[%c0, %c0_1] : memref<128x128xbf16, #tpu.memory_space<vmem>>, vector<128x128xbf16>
    %c0_2 = arith.constant 0 : index
    %c0_3 = arith.constant 0 : index
    %4 = vector.load %arg8[%c0_2, %c0_3] : memref<128x128xbf16, #tpu.memory_space<vmem>>, vector<128x128xbf16>
    %cst = arith.constant dense<0.000000e+00> : vector<128x128xf32>
    %5 = tpu.matmul %3, %4, %cst {dimension_numbers = #tpu.dot_dimension_numbers<[1], [0], [0], [1], [0, 0, 1, 1], [], []>} : vector<128x128xbf16>, vector<128x128xbf16>, vector<128x128xf32> -> vector<128x128xf32>
    %6 = arith.truncf %5 : vector<128x128xf32> to vector<128x128xbf16>
    %c0_4 = arith.constant 0 : index
    %c0_5 = arith.constant 0 : index
    %c0_6 = arith.constant 0 : index
    %7 = vector.load %arg3[%c0_4, %c0_5, %c0_6] : memref<1x128x128xbf16, #tpu.memory_space<vmem>>, vector<1x128x128xbf16>
    %8 = vector.shape_cast %7 : vector<1x128x128xbf16> to vector<128x128xbf16>
    %cst_7 = arith.constant dense<0.000000e+00> : vector<128x128xf32>
    %9 = tpu.matmul %6, %8, %cst_7 {dimension_numbers = #tpu.dot_dimension_numbers<[1], [0], [0], [1], [0, 0, 1, 1], [], []>} : vector<128x128xbf16>, vector<128x128xbf16>, vector<128x128xf32> -> vector<128x128xf32>
    %c0_8 = arith.constant 0 : index
    %c0_9 = arith.constant 0 : index
    %c0_10 = arith.constant 0 : index
    %10 = vector.load %arg4[%c0_8, %c0_9, %c0_10] : memref<1x1x128xf32, #tpu.memory_space<vmem>>, vector<1x1x128xf32>
    %11 = vector.shape_cast %10 : vector<1x1x128xf32> to vector<1x128xf32>
    %12 = vector.broadcast %11 : vector<1x128xf32> to vector<128x128xf32>
    %13 = arith.addf %9, %12 : vector<128x128xf32>
    %cst_11 = arith.constant 0.000000e+00 : f32
    %14 = vector.broadcast %cst_11 : f32 to vector<128x128xf32>
    %15 = arith.maximumf %13, %14 : vector<128x128xf32>
    %16 = arith.truncf %15 : vector<128x128xf32> to vector<128x128xbf16>
    %c0_12 = arith.constant 0 : index
    %c0_13 = arith.constant 0 : index
    %c0_14 = arith.constant 0 : index
    %17 = vector.load %arg5[%c0_12, %c0_13, %c0_14] : memref<1x128x128xbf16, #tpu.memory_space<vmem>>, vector<1x128x128xbf16>
    %18 = vector.shape_cast %17 : vector<1x128x128xbf16> to vector<128x128xbf16>
    %cst_15 = arith.constant dense<0.000000e+00> : vector<128x128xf32>
    %19 = tpu.matmul %16, %18, %cst_15 {dimension_numbers = #tpu.dot_dimension_numbers<[1], [0], [0], [1], [0, 0, 1, 1], [], []>} : vector<128x128xbf16>, vector<128x128xbf16>, vector<128x128xf32> -> vector<128x128xf32>
    %c0_16 = arith.constant 0 : index
    %c0_17 = arith.constant 0 : index
    %c0_18 = arith.constant 0 : index
    %20 = vector.load %arg6[%c0_16, %c0_17, %c0_18] : memref<1x1x128xf32, #tpu.memory_space<vmem>>, vector<1x1x128xf32>
    %21 = vector.shape_cast %20 : vector<1x1x128xf32> to vector<1x128xf32>
    %22 = vector.broadcast %21 : vector<1x128xf32> to vector<128x128xf32>
    %23 = arith.addf %19, %22 : vector<128x128xf32>
    %c0_i32_19 = arith.constant 0 : i32
    %24 = arith.cmpi eq, %arg0, %c0_i32_19 : i32
    %c2_i32 = arith.constant 2 : i32
    %25 = arith.cmpi ne, %arg0, %c2_i32 : i32
    %26 = arith.ori %24, %25 : i1
    %cst_20 = arith.constant 0.000000e+00 : f32
    %27 = vector.broadcast %cst_20 : f32 to vector<128x128xf32>
    %28 = arith.maximumf %23, %27 : vector<128x128xf32>
    %29 = arith.select %26, %28, %23 : vector<128x128xf32>
    %c2_i32_21 = arith.constant 2 : i32
    %30 = arith.cmpi slt, %arg0, %c2_i32_21 : i32
    %31 = arith.extui %30 : i1 to i32
    %c0_i32_22 = arith.constant 0 : i32
    %32 = arith.cmpi ne, %31, %c0_i32_22 : i32
    scf.if %32 {
      %36 = arith.truncf %29 : vector<128x128xf32> to vector<128x128xbf16>
      %c0_25 = arith.constant 0 : index
      %c0_26 = arith.constant 0 : index
      %37 = vector.load %arg8[%c0_25, %c0_26] : memref<128x128xbf16, #tpu.memory_space<vmem>>, vector<128x128xbf16>
      tpu.vector_store %arg8[%c0_25, %c0_26], %36 {strides = array<i32>} : memref<128x128xbf16, #tpu.memory_space<vmem>>, vector<128x128xbf16>,
    } else {
    }
    %c2_i32_23 = arith.constant 2 : i32
    %33 = arith.cmpi eq, %arg0, %c2_i32_23 : i32
    %34 = arith.extui %33 : i1 to i32
    %c0_i32_24 = arith.constant 0 : i32
    %35 = arith.cmpi ne, %34, %c0_i32_24 : i32
    scf.if %35 {
      %c0_25 = arith.constant 0 : index
      %c0_26 = arith.constant 0 : index
      %36 = vector.load %arg7[%c0_25, %c0_26] : memref<128x128xf32, #tpu.memory_space<vmem>>, vector<128x128xf32>
      tpu.vector_store %arg7[%c0_25, %c0_26], %29 {strides = array<i32>} : memref<128x128xf32, #tpu.memory_space<vmem>>, vector<128x128xf32>,
    } else {
    }
    return
  }
  func.func @transform_0(%arg0: i32) -> (i32, i32) {
    %c0_i32 = arith.constant 0 : i32
    %c0_i32_0 = arith.constant 0 : i32
    %c0_i32_1 = arith.constant 0 : i32
    return %c0_i32, %c0_i32_0 : i32, i32
  }
  func.func @transform_1(%arg0: i32) -> (i32, i32) {
    %c0_i32 = arith.constant 0 : i32
    %c0_i32_0 = arith.constant 0 : i32
    %c0_i32_1 = arith.constant 0 : i32
    return %c0_i32, %c0_i32_0 : i32, i32
  }
  func.func @transform_2(%arg0: i32) -> (i32, i32, i32) {
    %c0_i32 = arith.constant 0 : i32
    %c0_i32_0 = arith.constant 0 : i32
    %c0_i32_1 = arith.constant 0 : i32
    return %arg0, %c0_i32, %c0_i32_0 : i32, i32, i32
  }
  func.func @transform_3(%arg0: i32) -> (i32, i32, i32) {
    %c0_i32 = arith.constant 0 : i32
    %c0_i32_0 = arith.constant 0 : i32
    %c0_i32_1 = arith.constant 0 : i32
    return %arg0, %c0_i32, %c0_i32_0 : i32, i32, i32
  }
  func.func @transform_4(%arg0: i32) -> (i32, i32, i32) {
    %c0_i32 = arith.constant 0 : i32
    %c0_i32_0 = arith.constant 0 : i32
    %c0_i32_1 = arith.constant 0 : i32
    return %arg0, %c0_i32, %c0_i32_0 : i32, i32, i32
  }
  func.func @transform_5(%arg0: i32) -> (i32, i32, i32) {
    %c0_i32 = arith.constant 0 : i32
    %c0_i32_0 = arith.constant 0 : i32
    %c0_i32_1 = arith.constant 0 : i32
    return %arg0, %c0_i32, %c0_i32_0 : i32, i32, i32
  }
  func.func @transform_6(%arg0: i32) -> (i32, i32) {
    %c0_i32 = arith.constant 0 : i32
    %c0_i32_0 = arith.constant 0 : i32
    %c0_i32_1 = arith.constant 0 : i32
    return %c0_i32, %c0_i32_0 : i32, i32
  }
}

</mosaic_0001>

<bundles_post_ra>
// kernel: tpu_custom_call.1
= control target key start
LH: loop header
LB: loop body
LE: loop exit
PB: predicated region body
PF: predicated region fallthrough
CT: control target
= control target key end

     0   :  { %11 = vsyncpa [#allocation4], 0  ;;  %s2202_s0 = inlined_call_operand.hbm [shape: bf16[128,128], index: 0, kind: input, shape index: {}]   ;;  %s2203_s1 = inlined_call_operand.hbm [shape: bf16[128,128], index: 1, kind: input, shape index: {}]   ;;  %s2204_s2 = inlined_call_operand.hbm [shape: bf16[3,128,128], index: 2, kind: input, shape index: {}]   ;;  %s2205_s3 = inlined_call_operand.vmem [shape: f32[3,1,128], index: 3, kind: input, shape index: {}]   ;;  %s2206_s4 = inlined_call_operand.hbm [shape: bf16[3,128,128], index: 4, kind: input, shape index: {}]   ;;  %s2207_s5 = inlined_call_operand.vmem [shape: f32[3,1,128], index: 5, kind: input, shape index: {}]   ;;  %s2208_s6 = inlined_call_operand.hbm [shape: f32[128,128], index: 6, kind: output, shape index: {}]  }
   0x1   :  { %12 = vsyncpa [#allocation7], 0 }
   0x2   :  { %13 = vsyncpa [#allocation5], 0  ;;  %s1867_s21 = smov 0   ;;  %s1869_s22 = smov 0  }
   0x3   :  { %s1871_s23 = smov 0   ;;  %s1873_s24 = smov 0  }
   0x4 LB: > { %s1886_s25 = sadd.s32 4294967295, %s1821_s24   ;;  %s1889_s26 = sadd.s32 1, %s1821_s24   ;;  %s1821_s24 = sphi %s1873_s24, %s2234_s24   ;;  %s1817_s23 = sphi %s1871_s23, %s2233_s23   ;;  %s1813_s22 = sphi %s1869_s22, %s2232_s22   ;;  %s1809_s21 = sphi %s1867_s21, %s2231_s21  }
   0x5   : > { %s65_s27 = ssub.s32 %s1821_s24, %s1889_s26  ;;  %s68_s28 = sadd.s32 1, %s1817_s23 }
   0x6   : > { %p66_p0 = scmp.eq.s32.totalorder %s65_s27, 0  ;;  %p75_p1 = scmp.ne.s32.totalorder %s1817_s23, %s1813_s22 }
   0x7   : > { %p76_p2 = scmp.eq.s32.totalorder %s1821_s24, 0  ;;  %p81_p3 = scmp.ne.s32.totalorder %s1813_s22, %s1809_s21 }
   0x8   : > { %s1899_s29 = scalar_select %p66_p0, %s1817_s23, %s68_s28  }
   0x9   : > { %p1901_p4 = por %p76_p2, %p75_p1  ;;  %p2209_p5 = scmp.eq.s32.totalorder %s1886_s25, 0 }
   0xa   : > { %2214 = sst [smem:[#allocation15_spill]] %s1899_s29  ;;  %p1238_p6 = scmp.ge.s32.totalorder %s1821_s24, 1 }
   0xb   : > { %p191_p7 = scmp.lt.s32.totalorder %s1821_s24, 4  ;;  %p1910_p8 = por %p2209_p5, %p81_p3 }
   0xc   : > { %s1823_s9 = smov [#allocation3]   ;;  %p1567_p13 = scmp.lt.s32.totalorder %s1821_s24, 3 }
   0xd   : > { %s2216_s7 = scalar_select %p1910_p8, 1, 0 }
   0xe   : > { %p1915_p10 = pnand %p1238_p6, %p191_p7  ;;  %s203_s10 = sshll.u32 %s1823_s9, 4  ;;  %s204_s10 = int_to_ptr.vmem [resolvable:$true] %s203_s10 }
   0xf   : > { %s230_s12 = sand.u32 1, %s1821_s24   ;;  %s232_s13 = sand.u32 1, %s1817_s23  }
  0x10   : > { %s2217_s8 = scalar_select %p1915_p10, 1, 0 }
  0x11   : > { %p1551_p11 = pneg %p1915_p10  ;;  %p1932_p0 = pnand %p1567_p13, %p1901_p4 }
  0x12   : > { %s1654_s15 = scalar_lea.vmem %s204_s10, 1024  ;;  %p1662_p7 = scmp.lt.s32.totalorder %s204_s10, %s204_s10 }
  0x13   : > { %p1923_p12 = pnand %p1551_p11, %p2209_p5  ;;  %p1655_p2 = scmp.ne.s32.totalorder %s204_s10, %s1654_s15 }
  0x14   : > { %p1663_p11 = scmp.lt.s32.totalorder %s1654_s15, %s1654_s15 }
  0x15   : > { %p2211_p1 = pneg %p1923_p12 }
  0x16   : > { %p1664_p9 = por %p1663_p11, %p1662_p7 }
  0x17   : > { %p1657_p3 = pnand %p1655_p2, %p2211_p1 }
  0x19   : > { %p1658_p6 = pneg %p1657_p3 }
  0x1b   : > { %p1665_p5 = pnand %p1664_p9, %p1658_p6 }
  0x1d   : > { %1668 = shalt.err (!%p1665_p5)
}
  0x1e   : > { %s1824_s16 = smov 64   ;;  %s1825_s17 = smov 4  }
  0x1f   : > { %1554 = dma.hbm_to_vmem [thread:$0]  (!%p1923_p12), %s2202_s0, 1024, %s204_s10, [#allocation4], %s1824_s16, %s1824_s16, %s1825_s17  }
  0x20   : > { %s1949_s20 = sshll.u32 %s232_s13, 6  ;;  %s2210_s21 = sshll.u32 %s1821_s24, 10 }
  0x21   : > { %s1957_s30 = scalar_lea.hbm %s2204_s2, %s2210_s21  ;;  %s234_s9 = scalar_lea.vmem [#allocation8], %s1949_s20 }
  0x22   : > { %s241_s15 = sshll.u32 %s234_s9, 4  ;;  %s1826_s29 = smov [#allocation6]   ;;  %s1960_s15 = int_to_ptr.vmem [resolvable:$true] %s241_s15 }
  0x23   : > { %s1962_s18 = sshll.u32 %s1826_s29, 4  ;;  %s1964_s10 = scalar_lea.sflag [#allocation4], %s230_s12  ;;  %s217_s18 = int_to_ptr.vmem [resolvable:$true] %s1962_s18 }
  0x24   : > { %s1669_s13 = scalar_lea.hbm %s1957_s30, 1024  ;;  %p1671_p5 = pneg %p1932_p0 }
  0x25   : > { %p1670_p4 = scmp.ne.s32.totalorder %s1957_s30, %s1669_s13  ;;  %s1674_s28 = scalar_lea.hbm %s2204_s2, 3072 }
  0x26   : > { %p1675_p2 = scmp.lt.s32.totalorder %s1957_s30, %s2204_s2  ;;  %p1676_p3 = scmp.lt.s32.totalorder %s1674_s28, %s1669_s13 }
  0x27   : > { %p1672_p9 = pnand %p1671_p5, %p1670_p4 }
  0x28   : > { %p1677_p6 = por %p1676_p3, %p1675_p2 }
  0x29   : > { %p1673_p13 = pneg %p1672_p9 }
  0x2b   : > { %p1678_p7 = pnand %p1677_p6, %p1673_p13 }
  0x2d   : > { %1681 = shalt.err (!%p1678_p7)
}
  0x2e   : > { %s1682_s29 = scalar_lea.vmem %s1960_s15, 1024  ;;  %s1827_s12 = smov [#allocation8]  }
  0x2f   : > { %p1683_p11 = scmp.ne.s32.totalorder %s1960_s15, %s1682_s29  ;;  %s1687_s19 = sshll.u32 %s1827_s12, 4  ;;  %s1688_s19 = int_to_ptr.vmem [resolvable:$false] %s1687_s19 }
  0x30   : > { %s1689_s27 = scalar_lea.vmem %s1688_s19, 2048  ;;  %p1690_p1 = scmp.lt.s32.totalorder %s1960_s15, %s1688_s19 }
  0x31   : > { %p1685_p4 = pnand %p1683_p11, %p1671_p5  ;;  %p1691_p8 = scmp.lt.s32.totalorder %s1689_s27, %s1682_s29 }
  0x33   : > { %p1686_p9 = pneg %p1685_p4  ;;  %p1692_p10 = por %p1691_p8, %p1690_p1 }
  0x35   : > { %p1693_p2 = pnand %p1692_p10, %p1686_p9 }
  0x37   : > { %1696 = shalt.err (!%p1693_p2)
}
  0x38   : > { %1561 = dma.hbm_to_vmem [thread:$0]  (!%p1932_p0), %s1957_s30, 1024, %s1960_s15, %s1964_s10, %s1824_s16, %s1824_s16, %s1825_s17  }
  0x39   : > { %s1708_s21 = scalar_lea.vmem %s217_s18, 1024  ;;  %p2220_p3 = pneg %p1923_p12 }
  0x3a   : > { %p1709_p13 = scmp.ne.s32.totalorder %s217_s18, %s1708_s21  ;;  %p1716_p10 = scmp.lt.s32.totalorder %s217_s18, %s217_s18 }
  0x3b   : > { %p1717_p1 = scmp.lt.s32.totalorder %s1708_s21, %s1708_s21 }
  0x3c   : > { %p1711_p6 = pnand %p1709_p13, %p2220_p3 }
  0x3d   : > { %p1718_p7 = por %p1717_p1, %p1716_p10 }
  0x3e   : > { %p1712_p8 = pneg %p1711_p6 }
  0x40   : > { %p1719_p11 = pnand %p1718_p7, %p1712_p8 }
  0x42   : > { %1722 = shalt.err (!%p1719_p11)
}
  0x43   : > { %1557 = dma.hbm_to_vmem [thread:$0]  (!%p1923_p12), %s2203_s1, 1024, %s217_s18, [#allocation7], %s1824_s16, %s1824_s16, %s1825_s17  }
  0x44   : > { %s2221_s30 = sshll.u32 %s1821_s24, 10  ;;  %s261_s11 = scalar_lea.vmem [#allocation9], %s1949_s20 }
  0x45   : > { %s2011_s29 = scalar_lea.hbm %s2206_s4, %s2221_s30  ;;  %s268_s12 = sshll.u32 %s261_s11, 4  ;;  %s269_s12 = int_to_ptr.vmem [resolvable:$true] %s268_s12 }
  0x46   : > { %s1723_s19 = scalar_lea.hbm %s2011_s29, 1024  ;;  %s1728_s24 = scalar_lea.hbm %s2206_s4, 3072 }
  0x47   : > { %p1724_p4 = scmp.ne.s32.totalorder %s2011_s29, %s1723_s19  ;;  %p1729_p12 = scmp.lt.s32.totalorder %s2011_s29, %s2206_s4 }
  0x48   : > { %p1730_p13 = scmp.lt.s32.totalorder %s1728_s24, %s1723_s19 }
  0x49   : > { %p1726_p9 = pnand %p1724_p4, %p1671_p5 }
  0x4a   : > { %p1731_p3 = por %p1730_p13, %p1729_p12 }
  0x4b   : > { %p1727_p2 = pneg %p1726_p9 }
  0x4d   : > { %p1732_p6 = pnand %p1731_p3, %p1727_p2 }
  0x4f   : > { %1735 = shalt.err (!%p1732_p6)
}
  0x50   : > { %s1736_s20 = scalar_lea.vmem %s269_s12, 1024  ;;  %s1828_s28 = smov [#allocation9]  }
  0x51   : > { %p1737_p8 = scmp.ne.s32.totalorder %s269_s12, %s1736_s20  ;;  %s1741_s30 = sshll.u32 %s1828_s28, 4  ;;  %s1742_s30 = int_to_ptr.vmem [resolvable:$false] %s1741_s30 }
  0x52   : > { %s1743_s15 = scalar_lea.vmem %s1742_s30, 2048  ;;  %p1744_p7 = scmp.lt.s32.totalorder %s269_s12, %s1742_s30 }
  0x53   : > { %p1739_p10 = pnand %p1737_p8, %p1671_p5  ;;  %p1745_p11 = scmp.lt.s32.totalorder %s1743_s15, %s1736_s20 }
  0x55   : > { %p1740_p1 = pneg %p1739_p10  ;;  %p1746_p4 = por %p1745_p11, %p1744_p7 }
  0x57   : > { %p1747_p9 = pnand %p1746_p4, %p1740_p1 }
  0x59   : > { %1750 = shalt.err (!%p1747_p9)
}
  0x5a   : > { %1564 = dma.hbm_to_vmem [thread:$0]  (!%p1932_p0), %s2011_s29, 1024, %s269_s12, %s1964_s10, %s1824_s16, %s1824_s16, %s1825_s17  }
  0x5b   : > { %p2222_p5 = scmp.ne.s32.totalorder %s2217_s8, 0 }
  0x5c   : > { %p2223_p2 = scmp.eq.s32.totalorder (!%p2222_p5), %s1886_s25, 0 }
  0x5d   : > { %286 = sbr.rel (%p2222_p5) target bundleno = 830 (0x33e), region = 44 }
  0x62   : > { %1792 = dma.done.wait (%p2223_p2), [#allocation4], 1024   ;;  %p2224_p12 = pmov %p2223_p2 }
  0x63   : > { %p2225_p13 = pmov %p2223_p2 }
  0x64   : > { %1794 = vsyncadd (%p2224_p12), [#allocation4], 4294966272 }
  0x65   : > { %1796 = dma.done.wait (%p2225_p13), [#allocation7], 1024   ;;  %p2226_p3 = pmov %p2223_p2 }
  0x66   : > { %s296_s14 = sand.u32 1, %s1886_s25   ;;  %s298_s16 = sand.u32 1, %s1813_s22  }
  0x67   : > { %1798 = vsyncadd (%p2226_p3), [#allocation7], 4294966272  ;;  %s1251_s17 = sshll.u32 %s298_s16, 6  ;;  %s297_s8 = scalar_lea.sflag [#allocation4], %s296_s14 }
  0x68   : > { %s2048_s10 = scalar_lea.vmem [#allocation8], %s1251_s17  ;;  %p2227_p0 = scmp.ne.s32.totalorder %s2216_s7, 0 }
  0x6a   : > { %1800 = dma.done.wait (%p2227_p0), %s297_s8, 2048  }
  0x6b   : > { %1802 = vsyncadd (%p2227_p0), %s297_s8, 4294965248  ;;  %p344_p6 = scmp.lt.s32.totalorder %s1886_s25, 2  ;;  %s2066_s24 = scalar_lea.vmem [#allocation9], %s1251_s17 }
  0x6c   : > { %p2228_p8 = scmp.ne.s32.totalorder %s1886_s25, 0 }
  0x6d   : > { %s2056_s9 = scalar_select %p344_p6, %s1886_s25, 2 }
  0x6e   : > { %354 = sbr.rel (%p2228_p8) target bundleno = 120 (0x78), region = 64 }
  0x6f   : > { %s346_s12 = scalar_lea.vmem %s2205_s3, %s2056_s9  ;;  %s349_s18 = scalar_lea.vmem %s2207_s5, %s2056_s9 }
  0x73   : > { %v355_v0 = vld [vmem:[#allocation6] sm:$0xff]   ;;  %v357_v1 = vld [vmem:[#allocation6 + $0x8] sm:$0xff]   ;;  %v359_v2 = vld [vmem:[#allocation6 + $0x10] sm:$0xff]  }
  0x74   : > { %371 = vst [vmem:[#allocation2] sm:$0xff] %v355_v0   ;;  %373 = vst [vmem:[#allocation2 + $0x8] sm:$0xff] %v357_v1   ;;  %v361_v3 = vld [vmem:[#allocation6 + $0x18] sm:$0xff]   ;;  %v363_v4 = vld [vmem:[#allocation6 + $0x20] sm:$0xff]  }
  0x75   : > { %375 = vst [vmem:[#allocation2 + $0x10] sm:$0xff] %v359_v2   ;;  %v365_v5 = vld [vmem:[#allocation6 + $0x28] sm:$0xff]   ;;  %377 = vst [vmem:[#allocation2 + $0x18] sm:$0xff] %v361_v3   ;;  %v367_v6 = vld [vmem:[#allocation6 + $0x30] sm:$0xff]  }
  0x76   : > { %379 = vst [vmem:[#allocation2 + $0x20] sm:$0xff] %v363_v4   ;;  %381 = vst [vmem:[#allocation2 + $0x28] sm:$0xff] %v365_v5   ;;  %v369_v7 = vld [vmem:[#allocation6 + $0x38] sm:$0xff]  }
  0x77   : > { %383 = vst [vmem:[#allocation2 + $0x30] sm:$0xff] %v367_v6   ;;  %385 = vst [vmem:[#allocation2 + $0x38] sm:$0xff] %v369_v7  }
  0x78 PF: > { %v1619_v12 = vld [vmem:[#allocation3] sm:$0xff]   ;;  %v1627_v15 = vld [vmem:[%s2048_s10 + $0x38] sm:$0xff]   ;;  %v1628_v16 = vld [vmem:[%s2048_s10 + $0x30] sm:$0xff]   ;;  %p980_p10 = scmp.ne.s32.totalorder %s1886_s25, 2  ;;  %p2229_p1 = scmp.eq.s32.totalorder %s1886_s25, 0 }
  0x79   : > { %1439 = vmatprep.mubr.bf16.mxu0 %v1619_v12  ;;  %1455 = vmatprep.subr.bf16.mxu1 %v1627_v15  ;;  %v1629_v18 = vld [vmem:[%s2048_s10 + $0x28] sm:$0xff]   ;;  %v1630_v20 = vld [vmem:[%s2048_s10 + $0x20] sm:$0xff]   ;;  %v1631_v21 = vld [vmem:[%s2048_s10 + $0x18] sm:$0xff]   ;;  %p1288_p11 = scmp.ge.s32.totalorder %s1886_s25, 2 }
  0x7a   : > { %1456 = vmatpush3.bf16.msra.mxu1 %v1627_v15  ;;  %v1620_v22 = vld [vmem:[#allocation3 + $0x8] sm:$0xff]   ;;  %v1621_v23 = vld [vmem:[#allocation3 + $0x10] sm:$0xff]   ;;  %v1622_v25 = vld [vmem:[#allocation3 + $0x18] sm:$0xff]   ;;  %p981_p7 = por %p980_p10, %p2229_p1 }
  0x7b   : > { %v1617_v17 = vld [vmem:[#allocation2 + $0x8] sm:$0xff]   ;;  %1457 = vmatprep.subr.bf16.mxu1 %v1628_v16  ;;  %v1618_v19 = vld [vmem:[#allocation2] sm:$0xff]   ;;  %v1632_v24 = vld [vmem:[%s2048_s10 + $0x10] sm:$0xff]  }
  0x7c   : > { %v1615_v13 = vld [vmem:[#allocation2 + $0x18] sm:$0xff]   ;;  %v1616_v14 = vld [vmem:[#allocation2 + $0x10] sm:$0xff]   ;;  %v1623_v26 = vld [vmem:[#allocation3 + $0x20] sm:$0xff]   ;;  %s998_s13 = scalar_select %p981_p7, 1, 0 }
  0x7d   : > { %v1613_v10 = vld [vmem:[#allocation2 + $0x28] sm:$0xff]   ;;  %v1614_v11 = vld [vmem:[#allocation2 + $0x20] sm:$0xff]   ;;  %v1625_v28 = vld [vmem:[#allocation3 + $0x30] sm:$0xff]  }
  0x7e   : > { %v1611_v8 = vld [vmem:[#allocation2 + $0x38] sm:$0xff]   ;;  %v1612_v9 = vld [vmem:[#allocation2 + $0x30] sm:$0xff]   ;;  %1458 = vmatpush3.bf16.msra.mxu1 %v1628_v16  ;;  %v1624_v27 = vld [vmem:[#allocation3 + $0x28] sm:$0xff]  }
  0x7f   : > { %1423 = vmatprep.subr.bf16.mxu0 %v1611_v8  ;;  %1459 = vmatprep.subr.bf16.mxu1 %v1629_v18  ;;  %v1626_v29 = vld [vmem:[#allocation3 + $0x38] sm:$0xff]   ;;  %v1633_v30 = vld [vmem:[%s2048_s10 + $0x8] sm:$0xff]   ;;  %v1634_v31 = vld [vmem:[%s2048_s10] sm:$0xff]  }
  0x80   : > { %1424 = vmatpush3.bf16.msra.mxu0 %v1611_v8  ;;  %v1635_v32 = vld [vmem:[%s2066_s24 + $0x38] sm:$0xff]   ;;  %v1636_v33 = vld [vmem:[%s2066_s24 + $0x30] sm:$0xff]   ;;  %v1637_v34 = vld [vmem:[%s2066_s24 + $0x28] sm:$0xff]  }
  0x81   : > { %1425 = vmatprep.subr.bf16.mxu0 %v1612_v9  ;;  %v1638_v35 = vld [vmem:[%s2066_s24 + $0x20] sm:$0xff]   ;;  %v1639_v36 = vld [vmem:[%s2066_s24 + $0x18] sm:$0xff]   ;;  %v1640_v61 = vld [vmem:[%s2066_s24 + $0x10] sm:$0xff]  }
  0x82   : > { %1460 = vmatpush3.bf16.msra.mxu1 %v1629_v18  ;;  %v1641_v62 = vld [vmem:[%s2066_s24 + $0x8] sm:$0xff]   ;;  %v1642_v63 = vld [vmem:[%s2066_s24] sm:$0xff]  }
  0x83   : > { %1461 = vmatprep.subr.bf16.mxu1 %v1630_v20  ;;  %v1270_v2 = vld [vmem:[%s346_s12] ss:$0 sm:$0xff] }
  0x84   : > { %1426 = vmatpush3.bf16.msra.mxu0 %v1612_v9 }
  0x85   : > { %1427 = vmatprep.subr.bf16.mxu0 %v1613_v10 }
  0x86   : > { %1462 = vmatpush3.bf16.msra.mxu1 %v1630_v20 }
  0x87   : > { %1463 = vmatprep.subr.bf16.mxu1 %v1631_v21 }
  0x88   : > { %1428 = vmatpush3.bf16.msra.mxu0 %v1613_v10 }
  0x89   : > { %1429 = vmatprep.subr.bf16.mxu0 %v1614_v11 }
  0x8a   : > { %1464 = vmatpush3.bf16.msra.mxu1 %v1631_v21 }
  0x8b   : > { %1465 = vmatprep.subr.bf16.mxu1 %v1632_v24 }
  0x8c   : > { %1430 = vmatpush3.bf16.msra.mxu0 %v1614_v11 }
  0x8d   : > { %1431 = vmatprep.subr.bf16.mxu0 %v1615_v13 }
  0x8e   : > { %1466 = vmatpush3.bf16.msra.mxu1 %v1632_v24 }
  0x8f   : > { %1467 = vmatprep.subr.bf16.mxu1 %v1633_v30 }
  0x90   : > { %1432 = vmatpush3.bf16.msra.mxu0 %v1615_v13 }
  0x91   : > { %1433 = vmatprep.subr.bf16.mxu0 %v1616_v14 }
  0x92   : > { %1468 = vmatpush3.bf16.msra.mxu1 %v1633_v30 }
  0x93   : > { %1469 = vmatprep.subr.bf16.mxu1 %v1634_v31 }
  0x94   : > { %1434 = vmatpush3.bf16.msra.mxu0 %v1616_v14 }
  0x95   : > { %1435 = vmatprep.subr.bf16.mxu0 %v1617_v17 }
  0x96   : > { %1470 = vmatpush3.bf16.msra.mxu1 %v1634_v31 }
  0x97   : > { %1519 = vmatprep.subr.bf16.mxu1 %v1635_v32 }
  0x98   : > { %1436 = vmatpush3.bf16.msra.mxu0 %v1617_v17 }
  0x99   : > { %1437 = vmatprep.subr.bf16.mxu0 %v1618_v19 }
  0x9c   : > { %1438 = vmatpush3.bf16.msra.mxu0 %v1618_v19 }
  0x9d   : > { %1487 = vmatprep.subr.bf16.mxu0 %v1635_v32 }
  0x9f   : > { %1440 = vmatmul.mubr.bf16.vlgmr.msra.gmra.mxu0 %v1620_v22 }
  0xa0   : > { %1443 = vmatprep.mubr.bf16.mxu0 %v1621_v23  ;;  %1488 = vmatpush3.bf16.msra.mxu0 %v1635_v32 }
  0xa1   : > { %1489 = vmatprep.subr.bf16.mxu0 %v1636_v33 }
  0xa4   : > { %1490 = vmatpush3.bf16.msra.mxu0 %v1636_v33 }
  0xa5   : > { %1491 = vmatprep.subr.bf16.mxu0 %v1637_v34 }
  0xa7   : > { %1444 = vmatmul.mubr.bf16.gmra.mxu0 %v1622_v25 }
  0xa8   : > { %1447 = vmatprep.mubr.bf16.mxu0 %v1623_v26  ;;  %1492 = vmatpush3.bf16.msra.mxu0 %v1637_v34 }
  0xa9   : > { %1493 = vmatprep.subr.bf16.mxu0 %v1638_v35 }
  0xac   : > { %1494 = vmatpush3.bf16.msra.mxu0 %v1638_v35 }
  0xad   : > { %1495 = vmatprep.subr.bf16.mxu0 %v1639_v36 }
  0xaf   : > { %1448 = vmatmul.mubr.bf16.gmra.mxu0 %v1624_v27 }
  0xb0   : > { %1451 = vmatprep.mubr.bf16.mxu0 %v1625_v28  ;;  %1496 = vmatpush3.bf16.msra.mxu0 %v1639_v36 }
  0xb1   : > { %1497 = vmatprep.subr.bf16.mxu0 %v1640_v61 }
  0xb4   : > { %1498 = vmatpush3.bf16.msra.mxu0 %v1640_v61 }
  0xb5   : > { %1499 = vmatprep.subr.bf16.mxu0 %v1641_v62 }
  0xb7   : > { %1452 = vmatmul.mubr.bf16.gmra.mxu0 %v1626_v29 }
  0xb8   : > { %1500 = vmatpush3.bf16.msra.mxu0 %v1641_v62 }
  0xb9   : > { %1501 = vmatprep.subr.bf16.mxu0 %v1642_v63 }
  0xbc   : > { %1502 = vmatpush3.bf16.msra.mxu0 %v1642_v63 }
 0x15f   : > { %v1441_v37 = vpop.f32.mrf.mxu0 }
 0x161   : > { %v549_v38 = vpop.f32.mrf.mxu0 }
 0x163   : > { %v1442_v39 = vpop.f32.mrf.mxu0 }
 0x164   : > { %v613_v42 = vpack.c.bf16 %v1442_v39, %v1441_v37 }
 0x165   : > { %v552_v40 = vpop.f32.mrf.mxu0 }
 0x166   : > { %v612_v41 = vpack.c.bf16 %v552_v40, %v549_v38 }
 0x167   : > { %v1445_v43 = vpop.f32.mrf.mxu0 }
 0x168   : > { %1471 = vmatprep.mubr.bf16.mxu1 %v612_v41 }
 0x169   : > { %v565_v44 = vpop.f32.mrf.mxu0  ;;  %1472 = vmatmul.mubr.bf16.vlgmr.msra.gmra.mxu1 %v613_v42 }
 0x16a   : > { %1527 = vmatpush3.bf16.msra.mxu1 %v1635_v32 }
 0x16b   : > { %v1446_v45 = vpop.f32.mrf.mxu0  ;;  %1520 = vmatprep.subr.bf16.mxu1 %v1636_v33 }
 0x16c   : > { %v615_v48 = vpack.c.bf16 %v1446_v45, %v1445_v43 }
 0x16d   : > { %v568_v46 = vpop.f32.mrf.mxu0 }
 0x16e   : > { %v614_v47 = vpack.c.bf16 %v568_v46, %v565_v44  ;;  %1528 = vmatpush3.bf16.msra.mxu1 %v1636_v33 }
 0x16f   : > { %v1449_v49 = vpop.f32.mrf.mxu0  ;;  %1521 = vmatprep.subr.bf16.mxu1 %v1637_v34 }
 0x170   : > { %1475 = vmatprep.mubr.bf16.mxu1 %v614_v47 }
 0x171   : > { %v581_v50 = vpop.f32.mrf.mxu0  ;;  %1476 = vmatmul.mubr.bf16.gmra.mxu1 %v615_v48 }
 0x172   : > { %1529 = vmatpush3.bf16.msra.mxu1 %v1637_v34 }
 0x173   : > { %v1450_v51 = vpop.f32.mrf.mxu0  ;;  %1522 = vmatprep.subr.bf16.mxu1 %v1638_v35 }
 0x174   : > { %v617_v54 = vpack.c.bf16 %v1450_v51, %v1449_v49 }
 0x175   : > { %v584_v52 = vpop.f32.mrf.mxu0 }
 0x176   : > { %v616_v53 = vpack.c.bf16 %v584_v52, %v581_v50  ;;  %1530 = vmatpush3.bf16.msra.mxu1 %v1638_v35 }
 0x177   : > { %v1453_v55 = vpop.f32.mrf.mxu0  ;;  %1523 = vmatprep.subr.bf16.mxu1 %v1639_v36 }
 0x178   : > { %1479 = vmatprep.mubr.bf16.mxu1 %v616_v53 }
 0x179   : > { %v597_v56 = vpop.f32.mrf.mxu0  ;;  %1480 = vmatmul.mubr.bf16.gmra.mxu1 %v617_v54 }
 0x17a   : > { %1531 = vmatpush3.bf16.msra.mxu1 %v1639_v36 }
 0x17b   : > { %v1454_v57 = vpop.f32.mrf.mxu0  ;;  %1524 = vmatprep.subr.bf16.mxu1 %v1640_v61 }
 0x17c   : > { %v619_v60 = vpack.c.bf16 %v1454_v57, %v1453_v55  ;;  %v2101_v57 = vld [vmem:[%s349_s18] ss:$0 sm:$0xff] }
 0x17d   : > { %v600_v58 = vpop.f32.mrf.mxu0 }
 0x17e   : > { %v618_v59 = vpack.c.bf16 %v600_v58, %v597_v56  ;;  %1532 = vmatpush3.bf16.msra.mxu1 %v1640_v61  ;;  %v2103_v58 = vstv %s998_s13 }
 0x17f   : > { %1525 = vmatprep.subr.bf16.mxu1 %v1641_v62  ;;  %vm1000_vm0 = vcmp.eq.s32.totalorder %v2103_v58, 1 }
 0x180   : > { %1483 = vmatprep.mubr.bf16.mxu1 %v618_v59 }
 0x181   : > { %1484 = vmatmul.mubr.bf16.gmra.mxu1 %v619_v60 }
 0x182   : > { %1533 = vmatpush3.bf16.msra.mxu1 %v1641_v62 }
 0x183   : > { %1526 = vmatprep.subr.bf16.mxu1 %v1642_v63 }
 0x186   : > { %1534 = vmatpush3.bf16.msra.mxu1 %v1642_v63 }
 0x229   : > { %v1473_v0 = vpop.f32.mrf.mxu1 }
 0x22a   : > { %v734_v6 = vadd.f32 %v1473_v0, %v1270_v2 }
 0x22b   : > { %v725_v1 = vpop.f32.mrf.mxu1 }
 0x22c   : > { %v726_v4 = vadd.f32 %v1270_v2, %v725_v1  ;;  %v790_v13 = vmax.f32 %v734_v6, 0.0 }
 0x22d   : > { %v1474_v3 = vpop.f32.mrf.mxu1 }
 0x22e   : > { %v737_v5 = vadd.f32 %v1474_v3, %v1270_v2  ;;  %v788_v11 = vmax.f32 %v726_v4, 0.0 }
 0x22f   : > { %v728_v7 = vpop.f32.mrf.mxu1 }
 0x230   : > { %v729_v8 = vadd.f32 %v1270_v2, %v728_v7  ;;  %v791_v9 = vmax.f32 %v737_v5, 0.0 }
 0x231   : > { %v1477_v10 = vpop.f32.mrf.mxu1 }
 0x232   : > { %v789_v12 = vmax.f32 %v729_v8, 0.0  ;;  %v805_v16 = vpack.c.bf16 %v791_v9, %v790_v13  ;;  %v750_v20 = vadd.f32 %v1477_v10, %v1270_v2 }
 0x233   : > { %v741_v14 = vpop.f32.mrf.mxu1 }
 0x234   : > { %v804_v15 = vpack.c.bf16 %v789_v12, %v788_v11  ;;  %v742_v18 = vadd.f32 %v1270_v2, %v741_v14  ;;  %v794_v27 = vmax.f32 %v750_v20, 0.0 }
 0x235   : > { %v1478_v17 = vpop.f32.mrf.mxu1 }
 0x236   : > { %v753_v19 = vadd.f32 %v1478_v17, %v1270_v2  ;;  %1503 = vmatprep.mubr.bf16.mxu0 %v804_v15  ;;  %v792_v25 = vmax.f32 %v742_v18, 0.0 }
 0x237   : > { %v744_v21 = vpop.f32.mrf.mxu1  ;;  %1504 = vmatmul.mubr.bf16.vlgmr.msra.gmra.mxu0 %v805_v16 }
 0x238   : > { %v745_v22 = vadd.f32 %v1270_v2, %v744_v21  ;;  %v795_v23 = vmax.f32 %v753_v19, 0.0 }
 0x239   : > { %v1481_v24 = vpop.f32.mrf.mxu1 }
 0x23a   : > { %v793_v26 = vmax.f32 %v745_v22, 0.0  ;;  %v807_v30 = vpack.c.bf16 %v795_v23, %v794_v27  ;;  %v766_v34 = vadd.f32 %v1481_v24, %v1270_v2 }
 0x23b   : > { %v757_v28 = vpop.f32.mrf.mxu1 }
 0x23c   : > { %v806_v29 = vpack.c.bf16 %v793_v26, %v792_v25  ;;  %v758_v32 = vadd.f32 %v1270_v2, %v757_v28  ;;  %v798_v41 = vmax.f32 %v766_v34, 0.0 }
 0x23d   : > { %v1482_v31 = vpop.f32.mrf.mxu1 }
 0x23e   : > { %v769_v33 = vadd.f32 %v1482_v31, %v1270_v2  ;;  %1507 = vmatprep.mubr.bf16.mxu0 %v806_v29  ;;  %v796_v39 = vmax.f32 %v758_v32, 0.0 }
 0x23f   : > { %v760_v35 = vpop.f32.mrf.mxu1  ;;  %1508 = vmatmul.mubr.bf16.gmra.mxu0 %v807_v30 }
 0x240   : > { %v761_v36 = vadd.f32 %v1270_v2, %v760_v35  ;;  %v799_v37 = vmax.f32 %v769_v33, 0.0 }
 0x241   : > { %v1485_v38 = vpop.f32.mrf.mxu1 }
 0x242   : > { %v797_v40 = vmax.f32 %v761_v36, 0.0  ;;  %v809_v44 = vpack.c.bf16 %v799_v37, %v798_v41  ;;  %v782_v48 = vadd.f32 %v1485_v38, %v1270_v2 }
 0x243   : > { %v773_v42 = vpop.f32.mrf.mxu1 }
 0x244   : > { %v808_v43 = vpack.c.bf16 %v797_v40, %v796_v39  ;;  %v774_v46 = vadd.f32 %v1270_v2, %v773_v42  ;;  %v802_v54 = vmax.f32 %v782_v48, 0.0 }
 0x245   : > { %v1486_v45 = vpop.f32.mrf.mxu1 }
 0x246   : > { %v785_v47 = vadd.f32 %v1486_v45, %v1270_v2  ;;  %1511 = vmatprep.mubr.bf16.mxu1 %v808_v43  ;;  %v800_v52 = vmax.f32 %v774_v46, 0.0 }
 0x247   : > { %v776_v49 = vpop.f32.mrf.mxu1  ;;  %1512 = vmatmul.mubr.bf16.vlgmr.msra.gmra.mxu1 %v809_v44 }
 0x248   : > { %v777_v50 = vadd.f32 %v1270_v2, %v776_v49  ;;  %v803_v51 = vmax.f32 %v785_v47, 0.0 }
 0x24a   : > { %v801_v53 = vmax.f32 %v777_v50, 0.0  ;;  %v811_v56 = vpack.c.bf16 %v803_v51, %v802_v54 }
 0x24c   : > { %v810_v55 = vpack.c.bf16 %v801_v53, %v800_v52 }
 0x24e   : > { %1515 = vmatprep.mubr.bf16.mxu1 %v810_v55 }
 0x24f   : > { %1516 = vmatmul.mubr.bf16.gmra.mxu1 %v811_v56 }
 0x2f7   : > { %v1505_v59 = vpop.f32.mrf.mxu0 }
 0x2f8   : > { %v926_v60 = vadd.f32 %v1505_v59, %v2101_v57 }
 0x2f9   : > { %v917_v61 = vpop.f32.mrf.mxu0 }
 0x2fa   : > { %v984_v62 = vmax.f32 %v926_v60, 0.0  ;;  %v918_v63 = vadd.f32 %v2101_v57, %v917_v61 }
 0x2fb   : > { %v1506_v0 = vpop.f32.mrf.mxu0 }
 0x2fc   : > { %v2110_v1 = vsel %vm1000_vm0, %v984_v62, %v926_v60  ;;  %v982_v2 = vmax.f32 %v918_v63, 0.0  ;;  %v929_v3 = vadd.f32 %v1506_v0, %v2101_v57 }
 0x2fd   : > { %v920_v4 = vpop.f32.mrf.mxu0 }
 0x2fe   : > { %v2115_v5 = vsel %vm1000_vm0, %v982_v2, %v918_v63  ;;  %v985_v6 = vmax.f32 %v929_v3, 0.0  ;;  %v921_v7 = vadd.f32 %v2101_v57, %v920_v4 }
 0x2ff   : > { %v1509_v8 = vpop.f32.mrf.mxu0 }
 0x300   : > { %v2120_v9 = vsel %vm1000_vm0, %v985_v6, %v929_v3  ;;  %v983_v10 = vmax.f32 %v921_v7, 0.0  ;;  %v942_v11 = vadd.f32 %v1509_v8, %v2101_v57 }
 0x301   : > { %v933_v12 = vpop.f32.mrf.mxu0 }
 0x302   : > { %v2125_v13 = vsel %vm1000_vm0, %v983_v10, %v921_v7  ;;  %v988_v14 = vmax.f32 %v942_v11, 0.0  ;;  %v934_v15 = vadd.f32 %v2101_v57, %v933_v12 }
 0x303   : > { %v1510_v16 = vpop.f32.mrf.mxu0 }
 0x304   : > { %v2130_v17 = vsel %vm1000_vm0, %v988_v14, %v942_v11  ;;  %v986_v18 = vmax.f32 %v934_v15, 0.0  ;;  %v945_v19 = vadd.f32 %v1510_v16, %v2101_v57 }
 0x305   : > { %v936_v20 = vpop.f32.mrf.mxu0 }
 0x306   : > { %v1005_v21 = vsel %vm1000_vm0, %v986_v18, %v934_v15  ;;  %v989_v22 = vmax.f32 %v945_v19, 0.0  ;;  %v937_v23 = vadd.f32 %v2101_v57, %v936_v20 }
 0x307   : > { %v1513_v24 = vpop.f32.mrf.mxu1 }
 0x308   : > { %v1008_v25 = vsel %vm1000_vm0, %v989_v22, %v945_v19  ;;  %v987_v26 = vmax.f32 %v937_v23, 0.0  ;;  %v958_v27 = vadd.f32 %v1513_v24, %v2101_v57 }
 0x309   : > { %v949_v28 = vpop.f32.mrf.mxu1 }
 0x30a   : > { %v1006_v29 = vsel %vm1000_vm0, %v987_v26, %v937_v23  ;;  %v992_v30 = vmax.f32 %v958_v27, 0.0  ;;  %v950_v31 = vadd.f32 %v2101_v57, %v949_v28 }
 0x30b   : > { %v1514_v32 = vpop.f32.mrf.mxu1 }
 0x30c   : > { %v1011_v33 = vsel %vm1000_vm0, %v992_v30, %v958_v27  ;;  %v990_v34 = vmax.f32 %v950_v31, 0.0  ;;  %v961_v35 = vadd.f32 %v1514_v32, %v2101_v57 }
 0x30d   : > { %v952_v36 = vpop.f32.mrf.mxu1 }
 0x30e   : > { %v1009_v37 = vsel %vm1000_vm0, %v990_v34, %v950_v31  ;;  %v993_v38 = vmax.f32 %v961_v35, 0.0  ;;  %v953_v39 = vadd.f32 %v2101_v57, %v952_v36 }
 0x30f   : > { %v1517_v40 = vpop.f32.mrf.mxu1 }
 0x310   : > { %v1012_v41 = vsel %vm1000_vm0, %v993_v38, %v961_v35  ;;  %v991_v42 = vmax.f32 %v953_v39, 0.0  ;;  %v974_v43 = vadd.f32 %v1517_v40, %v2101_v57 }
 0x311   : > { %v965_v44 = vpop.f32.mrf.mxu1 }
 0x312   : > { %v1010_v45 = vsel %vm1000_vm0, %v991_v42, %v953_v39  ;;  %v996_v46 = vmax.f32 %v974_v43, 0.0  ;;  %v966_v47 = vadd.f32 %v2101_v57, %v965_v44 }
 0x313   : > { %v1518_v48 = vpop.f32.mrf.mxu1 }
 0x314   : > { %v1015_v49 = vsel %vm1000_vm0, %v996_v46, %v974_v43  ;;  %v994_v50 = vmax.f32 %v966_v47, 0.0  ;;  %v977_v51 = vadd.f32 %v1518_v48, %v2101_v57 }
 0x315   : > { %v968_v52 = vpop.f32.mrf.mxu1 }
 0x316   : > { %v1013_v53 = vsel %vm1000_vm0, %v994_v50, %v966_v47  ;;  %v997_v54 = vmax.f32 %v977_v51, 0.0  ;;  %v969_v55 = vadd.f32 %v2101_v57, %v968_v52  ;;  %1020 = sbr.rel (%p1288_p11) target bundleno = 801 (0x321), region = 68 }
 0x318   : > { %v1016_v56 = vsel %vm1000_vm0, %v997_v54, %v977_v51  ;;  %v995_v59 = vmax.f32 %v969_v55, 0.0 }
 0x31a   : > { %v1014_v60 = vsel %vm1000_vm0, %v995_v59, %v969_v55 }
 0x31b   : > { %v1331_v61 = vpack.c.bf16 %v2125_v13, %v2115_v5  ;;  %v1336_v62 = vpack.c.bf16 %v2120_v9, %v2110_v1  ;;  %v1341_v63 = vpack.c.bf16 %v1006_v29, %v1005_v21  ;;  %v1346_v0 = vpack.c.bf16 %v1008_v25, %v2130_v17 }
 0x31c   : > { %v1351_v57 = vpack.c.bf16 %v1010_v45, %v1009_v37  ;;  %v1356_v2 = vpack.c.bf16 %v1012_v41, %v1011_v33  ;;  %v1361_v3 = vpack.c.bf16 %v1014_v60, %v1013_v53  ;;  %v1366_v4 = vpack.c.bf16 %v1016_v56, %v1015_v49 }
 0x31d   : > { %1332 = vst [vmem:[#allocation2] sm:$0xff] %v1331_v61   ;;  %1368 = vst [vmem:[#allocation2 + $0x8] sm:$0xff] %v1336_v62  }
 0x31e   : > { %1369 = vst [vmem:[#allocation2 + $0x10] sm:$0xff] %v1341_v63   ;;  %1370 = vst [vmem:[#allocation2 + $0x18] sm:$0xff] %v1346_v0  }
 0x31f   : > { %1371 = vst [vmem:[#allocation2 + $0x20] sm:$0xff] %v1351_v57   ;;  %1372 = vst [vmem:[#allocation2 + $0x28] sm:$0xff] %v1356_v2  }
 0x320   : > { %1373 = vst [vmem:[#allocation2 + $0x30] sm:$0xff] %v1361_v3   ;;  %1374 = vst [vmem:[#allocation2 + $0x38] sm:$0xff] %v1366_v4  }
 0x321 PF: > { %1104 = sbr.rel (%p980_p10) target bundleno = 814 (0x32e), region = 72 }
 0x326   : > { %1105 = vst [vmem:[#allocation10] sm:$0xff] %v2115_v5  ;;  %1106 = vst [vmem:[#allocation10 + $0x8] sm:$0xff] %v2125_v13 }
 0x327   : > { %1107 = vst [vmem:[#allocation10 + $0x10] sm:$0xff] %v2110_v1  ;;  %1108 = vst [vmem:[#allocation10 + $0x18] sm:$0xff] %v2120_v9 }
 0x328   : > { %1109 = vst [vmem:[#allocation10 + $0x20] sm:$0xff] %v1005_v21  ;;  %1110 = vst [vmem:[#allocation10 + $0x28] sm:$0xff] %v1006_v29 }
 0x329   : > { %1111 = vst [vmem:[#allocation10 + $0x30] sm:$0xff] %v2130_v17  ;;  %1112 = vst [vmem:[#allocation10 + $0x38] sm:$0xff] %v1008_v25 }
 0x32a   : > { %1113 = vst [vmem:[#allocation10 + $0x40] sm:$0xff] %v1009_v37  ;;  %1114 = vst [vmem:[#allocation10 + $0x48] sm:$0xff] %v1010_v45 }
 0x32b   : > { %1115 = vst [vmem:[#allocation10 + $0x50] sm:$0xff] %v1011_v33  ;;  %1116 = vst [vmem:[#allocation10 + $0x58] sm:$0xff] %v1012_v41 }
 0x32c   : > { %1117 = vst [vmem:[#allocation10 + $0x60] sm:$0xff] %v1013_v53  ;;  %1118 = vst [vmem:[#allocation10 + $0x68] sm:$0xff] %v1014_v60 }
 0x32d   : > { %1119 = vst [vmem:[#allocation10 + $0x70] sm:$0xff] %v1015_v49  ;;  %1120 = vst [vmem:[#allocation10 + $0x78] sm:$0xff] %v1016_v56 }
 0x32e PF: > { %p1570_p4 = scmp.eq.s32.totalorder %s1886_s25, 2  ;;  %s1829_s30 = smov [#allocation10]  }
 0x32f   : > { %s1127_s15 = sshll.u32 %s1829_s30, 4  ;;  %s1128_s15 = int_to_ptr.vmem [resolvable:$true] %s1127_s15 }
 0x330   : > { %s1751_s14 = scalar_lea.vmem %s1128_s15, 2048  ;;  %p1758_p12 = scmp.lt.s32.totalorder %s1128_s15, %s1128_s15 }
 0x331   : > { %p1752_p9 = scmp.ne.s32.totalorder %s1128_s15, %s1751_s14  ;;  %p1759_p13 = scmp.lt.s32.totalorder %s1751_s14, %s1751_s14 }
 0x333   : > { %p1753_p5 = pnand %p1752_p9, %p1570_p4  ;;  %p1760_p3 = por %p1759_p13, %p1758_p12 }
 0x335   : > { %p1754_p2 = pneg %p1753_p5 }
 0x337   : > { %p1761_p0 = pnand %p1760_p3, %p1754_p2 }
 0x339   : > { %1764 = shalt.err (!%p1761_p0)
}
 0x33a   : > { %s1830_s16 = smov 128   ;;  %s1831_s17 = smov 8  }
 0x33b   : > { %1548 = dma.vmem_to_hbm [thread:$0]  (%p1570_p4), %s1128_s15, 2048, %s2208_s6, [#allocation5], %s1830_s16, %s1830_s16, %s1831_s17  }
 0x33c   : > { %1804 = dma.done.wait (%p1570_p4), [#allocation5], 2048  }
 0x33d   : > { %1806 = vsyncadd (%p1570_p4), [#allocation5], 4294965248 }
 0x33e PF: > { %s2230_s9 = sld [smem:[#allocation15_spill]]  ;;  %p16_p6 = scmp.ge.s32.totalorder %s1889_s26, 5  }
 0x33f   : > { %s2231_s21 = smov %s1813_s22  ;;  %s2232_s22 = smov %s1817_s23 }
 0x340   : > { %s2234_s24 = smov %s1889_s26  ;;  %18 = sbr.rel (!%p16_p6) target bundleno = 4 (0x4), region = 117 }
 0x344   : > { %s2233_s23 = smov %s2230_s9 }
 0x345   :  { %1143 = vsyncpa [#allocation4], 1 }
 0x346   :  { %1145 = vsyncpa [#allocation4 + $0x1], 1 }
 0x347   :  { %1146 = vsyncpa [#allocation7], 1 }
 0x348   :  { %1147 = vsyncpa [#allocation5], 1 }
 0x349   :  { %1149 = vsyncpa [#allocation5 + $0x1], 1 }

</bundles_post_ra>
